<compile_context>
chip_gen: v5e
topology: v5e:2x2
jax: 0.10.0
libtpu: 0.0.40
codegen_flags: <defaults>
</compile_context>

<pallas_src>
import numpy as np
import jax
import jax.numpy as jnp
from jax.experimental import pallas as pl
from jax.experimental.pallas import tpu as pltpu


# ---------------------------------------------------------------------------
# Parameter construction (mirrors torch make_kernel / Blur.__init__)
# ---------------------------------------------------------------------------
def make_kernel(k):
    k = np.asarray(k, dtype=np.float32)
    if k.ndim == 1:
        k = np.outer(k, k)
    k = k / k.sum()
    return k


def _try_separate(k2d, tol=1e-6):
    """Return (vertical_taps, horizontal_taps) if k2d is (numerically) rank-1."""
    k = np.asarray(k2d, dtype=np.float64)
    u, s, vt = np.linalg.svd(k)
    if s.size > 1 and s[1] > tol * max(s[0], 1e-30):
        return None
    tv = (u[:, 0] * s[0]).astype(np.float32)
    th = vt[0, :].astype(np.float32)
    return tv, th


# ---------------------------------------------------------------------------
# VMEM budgeting helpers (generation-aware)
# ---------------------------------------------------------------------------
def _vmem_capacity_bytes():
    try:
        return int(pltpu.get_tpu_info().vmem_capacity_bytes)
    except Exception:
        return 64 * 1024 * 1024          # conservative (v7x per-core size)


def _padded_plane_bytes(h, w, dtype):
    """VMEM footprint of one (h, w) plane, padded to the (8,128) layout tiles."""
    itemsize = jnp.dtype(dtype).itemsize
    sub = 8 * max(1, 4 // itemsize)      # 8 rows f32, 16 bf16, 32 int8
    hp = -(-h // sub) * sub
    wp = -(-w // 128) * 128
    return hp * wp * itemsize


# ---------------------------------------------------------------------------
# In-kernel helpers
# ---------------------------------------------------------------------------
def _emit_pad_copy(x_ref, xp_ref, H, W, pad0, pad1):
    """Write the zero-padded (or cropped) input tile into xp_ref.

    All stores are full-width row slabs: interior rows are written as
    zeros||data||zeros (lane concat), pad rows as full-width zero strips.
    """
    lo = max(pad0, 0)                    # leading (top / left) pad width
    hi = max(pad1, 0)                    # trailing (bottom / right) pad width
    src0 = max(-pad0, 0)                 # crop amount for negative pads
    h_len = H - src0 - max(-pad1, 0)
    w_len = W - src0 - max(-pad1, 0)

    Pb, Hp, Wp = xp_ref.shape
    dt = xp_ref.dtype

    x = x_ref[...]                                        # (Pb, H, W)
    if (src0, h_len, w_len) != (0, H, W):                 # negative-pad crop
        x = x[:, src0:src0 + h_len, src0:src0 + w_len]

    if lo > 0 or hi > 0:
        parts = []
        if lo > 0:
            parts.append(jnp.zeros((Pb, h_len, lo), dt))
        parts.append(x)
        if hi > 0:
            parts.append(jnp.zeros((Pb, h_len, hi), dt))
        x = jnp.concatenate(parts, axis=2)                # (Pb, h_len, Wp)

    xp_ref[:, pl.ds(lo, h_len), :] = x
    if lo > 0:
        xp_ref[:, pl.ds(0, lo), :] = jnp.zeros((Pb, lo, Wp), dt)
    if hi > 0:
        xp_ref[:, pl.ds(Hp - hi, hi), :] = jnp.zeros((Pb, hi, Wp), dt)


def _make_separable_body(taps_v, taps_h, H, W, Ho, Wo, pad0, pad1):
    tv = [float(t) for t in taps_v]      # vertical taps   (already flipped)
    th = [float(t) for t in taps_h]      # horizontal taps (already flipped)

    def body(x_ref, o_ref, xp_ref, tmp_ref):
        _emit_pad_copy(x_ref, xp_ref, H, W, pad0, pad1)
        # Vertical (H / sublane) pass first, over only Ho output rows.
        acc = tv[0] * xp_ref[:, pl.ds(0, Ho), :].astype(jnp.float32)
        for i in range(1, len(tv)):
            acc = acc + tv[i] * xp_ref[:, pl.ds(i, Ho), :].astype(jnp.float32)
        tmp_ref[...] = acc                                # (Pb, Ho, Wp) f32
        # Horizontal (W / lane) pass on the smaller intermediate.
        out = th[0] * tmp_ref[:, :, pl.ds(0, Wo)]
        for j in range(1, len(th)):
            out = out + th[j] * tmp_ref[:, :, pl.ds(j, Wo)]
        o_ref[...] = out.astype(o_ref.dtype)

    return body


def _make_full_body(taps2d, H, W, Ho, Wo, pad0, pad1):
    kh, kw = taps2d.shape
    taps = [[float(taps2d[i, j]) for j in range(kw)] for i in range(kh)]

    def body(x_ref, o_ref, xp_ref, acc_ref):
        _emit_pad_copy(x_ref, xp_ref, H, W, pad0, pad1)
        for i in range(kh):
            row = taps[i][0] * xp_ref[:, pl.ds(i, Ho), pl.ds(0, Wo)].astype(jnp.float32)
            for j in range(1, kw):
                row = row + taps[i][j] * xp_ref[:, pl.ds(i, Ho), pl.ds(j, Wo)].astype(jnp.float32)
            if i == 0:
                acc_ref[...] = row
            else:
                acc_ref[...] += row
        o_ref[...] = acc_ref[...].astype(o_ref.dtype)

    return body


# ---------------------------------------------------------------------------
# Wrapper
# ---------------------------------------------------------------------------
def blur_pallas(x, kernel2d, pad, separable=None):
    """upfirdn2d(x, kernel2d, up=1, down=1, pad=pad) for NCHW `x` (NCHW out)."""
    N, C, H, W = x.shape
    kh, kw = kernel2d.shape
    pad0, pad1 = int(pad[0]), int(pad[1])

    Hp, Wp = H + pad0 + pad1, W + pad0 + pad1
    Ho, Wo = Hp - kh + 1, Wp - kw + 1
    if Ho <= 0 or Wo <= 0:
        raise ValueError(f"Blur output would be empty (Ho={Ho}, Wo={Wo})")

    P = N * C
    dt = x.dtype
    itemsize = dt.itemsize
    x3 = x.reshape(P, H, W)              # free reshape -- no transpose, no copy

    # Per-plane VMEM footprint: double-buffered in/out blocks + scratch.
    in_b = _padded_plane_bytes(H, W, dt)
    out_b = _padded_plane_bytes(Ho, Wo, dt)
    xp_b = _padded_plane_bytes(Hp, Wp, dt)
    if separable is not None:
        scratch_b = xp_b + _padded_plane_bytes(Ho, Wp, jnp.float32)
    else:
        scratch_b = xp_b + _padded_plane_bytes(Ho, Wo, jnp.float32)
    per_plane = 2 * (in_b + out_b) + scratch_b

    cap = _vmem_capacity_bytes()
    budget = int(cap * 0.45)

    divisors = [d for d in range(1, P + 1) if P % d == 0]
    fitting = [d for d in divisors if d * per_plane <= budget]
    if not fitting:
        fitting = [1]    # TODO(synk): H-halo spatial tiling for huge planes
    multi = [d for d in fitting if P // d >= 2]      # keep >= 2 grid steps
    pblk = max(multi) if multi else max(fitting)
    grid = (P // pblk,)

    if separable is not None:
        tv, th = separable
        body = _make_separable_body(np.asarray(tv)[::-1], np.asarray(th)[::-1],
                                    H, W, Ho, Wo, pad0, pad1)
        scratch_shapes = [pltpu.VMEM((pblk, Hp, Wp), dt),
                          pltpu.VMEM((pblk, Ho, Wp), jnp.float32)]
        flops = 2 * (kh + kw) * P * Ho * Wo
    else:
        body = _make_full_body(np.asarray(kernel2d)[::-1, ::-1],
                               H, W, Ho, Wo, pad0, pad1)
        scratch_shapes = [pltpu.VMEM((pblk, Hp, Wp), dt),
                          pltpu.VMEM((pblk, Ho, Wo), jnp.float32)]
        flops = 2 * kh * kw * P * Ho * Wo

    vmem_needed = pblk * per_plane
    vmem_limit = int(min(max(vmem_needed + (4 << 20), 32 << 20),
                         int(cap * 0.85)))

    out3 = pl.pallas_call(
        body,
        out_shape=jax.ShapeDtypeStruct((P, Ho, Wo), dt),
        grid=grid,
        in_specs=[pl.BlockSpec((pblk, H, W), lambda g: (g, 0, 0))],
        out_specs=pl.BlockSpec((pblk, Ho, Wo), lambda g: (g, 0, 0)),
        scratch_shapes=scratch_shapes,
        compiler_params=pltpu.CompilerParams(
            dimension_semantics=("parallel",),
            vmem_limit_bytes=vmem_limit),
        cost_estimate=pl.CostEstimate(
            flops=flops,
            transcendentals=0,
            bytes_accessed=P * (H * W + Ho * Wo) * itemsize),
    )(x3)

    return out3.reshape(N, C, Ho, Wo)


class Blur:
    """JAX/Pallas port of the PyTorch Blur module (NCHW in, NCHW out)."""

    def __init__(self, kernel, pad, upsample_factor=1):
        k_raw = np.asarray(kernel, dtype=np.float32)
        scale = float(upsample_factor) ** 2
        self.kernel = make_kernel(k_raw) * scale      # registered-buffer equiv.
        self.pad = (int(pad[0]), int(pad[1]))
        if k_raw.ndim == 1:                           # exact separable factors
            f = k_raw / k_raw.sum()
            self._sep = (f * scale, f)                # (vertical, horizontal)
        else:                                         # rank-1 detection (SVD)
            self._sep = _try_separate(self.kernel)

    def __call__(self, x):
        return blur_pallas(x, self.kernel, self.pad, separable=self._sep)


# ---------------------------------------------------------------------------
# Pure-JAX reference (explicit shifted sums)
# ---------------------------------------------------------------------------
def upfirdn2d_ref(x, kernel2d, pad):
    pad0, pad1 = pad
    xp = jnp.pad(x, ((0, 0), (0, 0), (pad0, pad1), (pad0, pad1)))
    kh, kw = kernel2d.shape
    Hp, Wp = xp.shape[2], xp.shape[3]
    Ho, Wo = Hp - kh + 1, Wp - kw + 1
    w = np.asarray(kernel2d, dtype=np.float32)[::-1, ::-1]
    out = jnp.zeros(x.shape[:2] + (Ho, Wo), jnp.float32)
    for i in range(kh):
        for j in range(kw):
            out = out + float(w[i, j]) * xp[:, :, i:i + Ho, j:j + Wo]
    return out.astype(x.dtype)


if __name__ == "__main__":
    key = jax.random.PRNGKey(0)
    x = jax.random.normal(key, (2, 4, 16, 16), dtype=jnp.float32)

    # Typical StyleGAN2 blur configuration: separable [1,3,3,1], pad=(2,1).
    blur = Blur(kernel=[1, 3, 3, 1], pad=(2, 1), upsample_factor=1)
    y = blur(x)
    jax.block_until_ready(y)
    y_ref = upfirdn2d_ref(x, blur.kernel, blur.pad)
    assert y.shape == y_ref.shape, (y.shape, y_ref.shape)
    np.testing.assert_allclose(np.asarray(y), np.asarray(y_ref),
                               rtol=1e-5, atol=1e-5)

    # Genuinely non-separable 2-D kernel (rank-2) -> full fallback path.
    lap = np.array([[0., 1., 0.], [1., 4., 1.], [0., 1., 0.]], dtype=np.float32)
    blur2d = Blur(kernel=lap, pad=(1, 1))
    assert blur2d._sep is None
    y2 = blur2d(x)
    jax.block_until_ready(y2)
    y2_ref = upfirdn2d_ref(x, blur2d.kernel, blur2d.pad)
    np.testing.assert_allclose(np.asarray(y2), np.asarray(y2_ref),
                               rtol=1e-5, atol=1e-5)

    # Rank-1 2-D kernel is auto-routed through the separable path.
    blur_r1 = Blur(kernel=np.outer([1., 2., 1.], [1., 2., 1.]).astype(np.float32),
                   pad=(1, 1))
    assert blur_r1._sep is not None
    y3 = blur_r1(x)
    jax.block_until_ready(y3)
    y3_ref = upfirdn2d_ref(x, blur_r1.kernel, blur_r1.pad)
    np.testing.assert_allclose(np.asarray(y3), np.asarray(y3_ref),
                               rtol=1e-5, atol=1e-5)

    print("KERNEL_OK")
</pallas_src>

<mosaic_0001>
module attributes {stable_mosaic.version = 11 : i64} {
  func.func @body(%arg0: i32, %arg1: memref<4x16x16xf32, #tpu.memory_space<vmem>>, %arg2: memref<4x16x16xf32, #tpu.memory_space<vmem>>, %arg3: memref<4x19x19xf32, #tpu.memory_space<vmem>>, %arg4: memref<4x16x19xf32, #tpu.memory_space<vmem>>) attributes {dimension_semantics = [#tpu.dimension_semantics<parallel>], iteration_bounds = array<i64: 2>, scalar_prefetch = 0 : i64, scratch_operands = 2 : i64, tpu.core_type = #tpu.core_type<tc>, window_params = [{transform_indices = @transform_0, window_bounds = array<i64: 4, 16, 16>}, {transform_indices = @transform_1, window_bounds = array<i64: 4, 16, 16>}]} {
    %c0 = arith.constant 0 : index
    %c0_0 = arith.constant 0 : index
    %c0_1 = arith.constant 0 : index
    %0 = vector.load %arg1[%c0, %c0_0, %c0_1] : memref<4x16x16xf32, #tpu.memory_space<vmem>>, vector<4x16x16xf32>
    %cst = arith.constant 0.000000e+00 : f32
    %1 = vector.broadcast %cst : f32 to vector<4x16x2xf32>
    %cst_2 = arith.constant 0.000000e+00 : f32
    %2 = vector.broadcast %cst_2 : f32 to vector<4x16x1xf32>
    %3 = tpu.concatenate %1, %0, %2 in 2 : vector<4x16x2xf32>, vector<4x16x16xf32>, vector<4x16x1xf32> -> vector<4x16x19xf32>
    %c0_3 = arith.constant 0 : index
    %c2 = arith.constant 2 : index
    %c0_4 = arith.constant 0 : index
    %4 = vector.load %arg3[%c0_3, %c2, %c0_4] : memref<4x19x19xf32, #tpu.memory_space<vmem>>, vector<4x16x19xf32>
    tpu.vector_store %arg3[%c0_3, %c2, %c0_4], %3 {strides = array<i32>} : memref<4x19x19xf32, #tpu.memory_space<vmem>>, vector<4x16x19xf32>,
    %cst_5 = arith.constant 0.000000e+00 : f32
    %5 = vector.broadcast %cst_5 : f32 to vector<4x2x19xf32>
    %c0_6 = arith.constant 0 : index
    %c0_7 = arith.constant 0 : index
    %c0_8 = arith.constant 0 : index
    %6 = vector.load %arg3[%c0_6, %c0_7, %c0_8] : memref<4x19x19xf32, #tpu.memory_space<vmem>>, vector<4x2x19xf32>
    tpu.vector_store %arg3[%c0_6, %c0_7, %c0_8], %5 {strides = array<i32>} : memref<4x19x19xf32, #tpu.memory_space<vmem>>, vector<4x2x19xf32>,
    %cst_9 = arith.constant 0.000000e+00 : f32
    %7 = vector.broadcast %cst_9 : f32 to vector<4x1x19xf32>
    %c0_10 = arith.constant 0 : index
    %c18 = arith.constant 18 : index
    %c0_11 = arith.constant 0 : index
    %8 = vector.load %arg3[%c0_10, %c18, %c0_11] : memref<4x19x19xf32, #tpu.memory_space<vmem>>, vector<4x1x19xf32>
    tpu.vector_store %arg3[%c0_10, %c18, %c0_11], %7 {strides = array<i32>} : memref<4x19x19xf32, #tpu.memory_space<vmem>>, vector<4x1x19xf32>,
    %c0_12 = arith.constant 0 : index
    %c0_13 = arith.constant 0 : index
    %c0_14 = arith.constant 0 : index
    %9 = vector.load %arg3[%c0_12, %c0_13, %c0_14] : memref<4x19x19xf32, #tpu.memory_space<vmem>>, vector<4x16x19xf32>
    %cst_15 = arith.constant 1.250000e-01 : f32
    %10 = vector.broadcast %cst_15 : f32 to vector<4x16x19xf32>
    %11 = arith.mulf %10, %9 : vector<4x16x19xf32>
    %c0_16 = arith.constant 0 : index
    %c1 = arith.constant 1 : index
    %c0_17 = arith.constant 0 : index
    %12 = vector.load %arg3[%c0_16, %c1, %c0_17] : memref<4x19x19xf32, #tpu.memory_space<vmem>>, vector<4x16x19xf32>
    %cst_18 = arith.constant 3.750000e-01 : f32
    %13 = vector.broadcast %cst_18 : f32 to vector<4x16x19xf32>
    %14 = arith.mulf %13, %12 : vector<4x16x19xf32>
    %15 = arith.addf %11, %14 : vector<4x16x19xf32>
    %c0_19 = arith.constant 0 : index
    %c2_20 = arith.constant 2 : index
    %c0_21 = arith.constant 0 : index
    %16 = vector.load %arg3[%c0_19, %c2_20, %c0_21] : memref<4x19x19xf32, #tpu.memory_space<vmem>>, vector<4x16x19xf32>
    %cst_22 = arith.constant 3.750000e-01 : f32
    %17 = vector.broadcast %cst_22 : f32 to vector<4x16x19xf32>
    %18 = arith.mulf %17, %16 : vector<4x16x19xf32>
    %19 = arith.addf %15, %18 : vector<4x16x19xf32>
    %c0_23 = arith.constant 0 : index
    %c3 = arith.constant 3 : index
    %c0_24 = arith.constant 0 : index
    %20 = vector.load %arg3[%c0_23, %c3, %c0_24] : memref<4x19x19xf32, #tpu.memory_space<vmem>>, vector<4x16x19xf32>
    %cst_25 = arith.constant 1.250000e-01 : f32
    %21 = vector.broadcast %cst_25 : f32 to vector<4x16x19xf32>
    %22 = arith.mulf %21, %20 : vector<4x16x19xf32>
    %23 = arith.addf %19, %22 : vector<4x16x19xf32>
    %c0_26 = arith.constant 0 : index
    %c0_27 = arith.constant 0 : index
    %c0_28 = arith.constant 0 : index
    %24 = vector.load %arg4[%c0_26, %c0_27, %c0_28] : memref<4x16x19xf32, #tpu.memory_space<vmem>>, vector<4x16x19xf32>
    tpu.vector_store %arg4[%c0_26, %c0_27, %c0_28], %23 {strides = array<i32>} : memref<4x16x19xf32, #tpu.memory_space<vmem>>, vector<4x16x19xf32>,
    %c0_29 = arith.constant 0 : index
    %c0_30 = arith.constant 0 : index
    %c0_31 = arith.constant 0 : index
    %25 = vector.load %arg4[%c0_29, %c0_30, %c0_31] : memref<4x16x19xf32, #tpu.memory_space<vmem>>, vector<4x16x16xf32>
    %cst_32 = arith.constant 1.250000e-01 : f32
    %26 = vector.broadcast %cst_32 : f32 to vector<4x16x16xf32>
    %27 = arith.mulf %26, %25 : vector<4x16x16xf32>
    %c0_33 = arith.constant 0 : index
    %c0_34 = arith.constant 0 : index
    %c1_35 = arith.constant 1 : index
    %28 = vector.load %arg4[%c0_33, %c0_34, %c1_35] : memref<4x16x19xf32, #tpu.memory_space<vmem>>, vector<4x16x16xf32>
    %cst_36 = arith.constant 3.750000e-01 : f32
    %29 = vector.broadcast %cst_36 : f32 to vector<4x16x16xf32>
    %30 = arith.mulf %29, %28 : vector<4x16x16xf32>
    %31 = arith.addf %27, %30 : vector<4x16x16xf32>
    %c0_37 = arith.constant 0 : index
    %c0_38 = arith.constant 0 : index
    %c2_39 = arith.constant 2 : index
    %32 = vector.load %arg4[%c0_37, %c0_38, %c2_39] : memref<4x16x19xf32, #tpu.memory_space<vmem>>, vector<4x16x16xf32>
    %cst_40 = arith.constant 3.750000e-01 : f32
    %33 = vector.broadcast %cst_40 : f32 to vector<4x16x16xf32>
    %34 = arith.mulf %33, %32 : vector<4x16x16xf32>
    %35 = arith.addf %31, %34 : vector<4x16x16xf32>
    %c0_41 = arith.constant 0 : index
    %c0_42 = arith.constant 0 : index
    %c3_43 = arith.constant 3 : index
    %36 = vector.load %arg4[%c0_41, %c0_42, %c3_43] : memref<4x16x19xf32, #tpu.memory_space<vmem>>, vector<4x16x16xf32>
    %cst_44 = arith.constant 1.250000e-01 : f32
    %37 = vector.broadcast %cst_44 : f32 to vector<4x16x16xf32>
    %38 = arith.mulf %37, %36 : vector<4x16x16xf32>
    %39 = arith.addf %35, %38 : vector<4x16x16xf32>
    %c0_45 = arith.constant 0 : index
    %c0_46 = arith.constant 0 : index
    %c0_47 = arith.constant 0 : index
    %40 = vector.load %arg2[%c0_45, %c0_46, %c0_47] : memref<4x16x16xf32, #tpu.memory_space<vmem>>, vector<4x16x16xf32>
    tpu.vector_store %arg2[%c0_45, %c0_46, %c0_47], %39 {strides = array<i32>} : memref<4x16x16xf32, #tpu.memory_space<vmem>>, vector<4x16x16xf32>,
    return
  }
  func.func @transform_0(%arg0: i32) -> (i32, i32, i32) {
    %c0_i32 = arith.constant 0 : i32
    %c0_i32_0 = arith.constant 0 : i32
    %c0_i32_1 = arith.constant 0 : i32
    return %arg0, %c0_i32, %c0_i32_0 : i32, i32, i32
  }
  func.func @transform_1(%arg0: i32) -> (i32, i32, i32) {
    %c0_i32 = arith.constant 0 : i32
    %c0_i32_0 = arith.constant 0 : i32
    %c0_i32_1 = arith.constant 0 : i32
    return %arg0, %c0_i32, %c0_i32_0 : i32, i32, i32
  }
}

</mosaic_0001>

<bundles_post_ra>
// kernel: tpu_custom_call.1
= control target key start
LH: loop header
LB: loop body
LE: loop exit
PB: predicated region body
PF: predicated region fallthrough
CT: control target
= control target key end

     0   :  { %6 = vsyncpa [#allocation5], 0  ;;  %s922_s0 = inlined_call_operand.hbm [shape: f32[8,16,16], index: 0, kind: input, shape index: {}]   ;;  %s923_s1 = inlined_call_operand.hbm [shape: f32[8,16,16], index: 1, kind: output, shape index: {}]  }
   0x1   :  { %8 = vsyncpa [#allocation5 + $0x1], 0 }
   0x2   :  { %9 = vsyncpa [#allocation6], 0 }
   0x3   :  { %11 = vsyncpa [#allocation6 + $0x1], 0  ;;  %s740_s6 = smov 0   ;;  %s742_s7 = smov 0  }
   0x4   :  { %s744_s8 = smov 0   ;;  %s746_s9 = smov 0  }
   0x5 LB: > { %s761_s10 = sadd.s32 4294967295, %s719_s9   ;;  %s548_s11 = sadd.s32 4294967294, %s719_s9   ;;  %s719_s9 = sphi %s746_s9, %s933_s9   ;;  %s715_s8 = sphi %s744_s8, %s932_s8   ;;  %s711_s7 = sphi %s742_s7, %s931_s7   ;;  %s707_s6 = sphi %s740_s6, %s930_s6  }
   0x6   : > { %s765_s12 = sadd.s32 1, %s719_s9   ;;  %s24_s13 = sadd.s32 1, %s715_s8 }
   0x7   : > { %s21_s14 = ssub.s32 %s719_s9, %s765_s12  ;;  %p31_p0 = scmp.ne.s32.totalorder %s715_s8, %s711_s7 }
   0x8   : > { %p22_p1 = scmp.eq.s32.totalorder %s21_s14, 0  ;;  %p32_p2 = scmp.eq.s32.totalorder %s719_s9, 0 }
   0x9   : > { %p37_p3 = scmp.ne.s32.totalorder %s711_s7, %s707_s6  ;;  %p38_p4 = scmp.eq.s32.totalorder %s761_s10, 0 }
   0xa   : > { %s777_s15 = scalar_select %p22_p1, %s715_s8, %s24_s13  }
   0xb   : > { %p779_p5 = por %p32_p2, %p31_p0  ;;  %p783_p6 = por %p38_p4, %p37_p3 }
   0xc   : > { %p61_p7 = scmp.eq.s32.totalorder %s761_s10, 1  ;;  %p67_p8 = scmp.eq.s32.totalorder %s548_s11, 1 }
   0xd   : > { %p580_p10 = scmp.lt.s32.totalorder %s719_s9, 2  ;;  %s87_s20 = sand.u32 1, %s715_s8  }
   0xe   : > { %p790_p11 = por %p61_p7, %p31_p0  ;;  %p794_p12 = por %p67_p8, %p37_p3 }
   0xf   : > { %s565_s21 = sshll.u32 %s719_s9, 6  ;;  %s551_s22 = sshll.u32 %s87_s20, 6 }
  0x10   : > { %s97_s25 = scalar_lea.hbm %s922_s0, %s565_s21  ;;  %s91_s27 = scalar_lea.vmem [#allocation4], %s551_s22 }
  0x11   : > { %s98_s26 = sshll.u32 %s97_s25, 4  ;;  %s100_s28 = sshll.u32 %s91_s27, 4  ;;  %s99_s26 = int_to_ptr.hbm [resolvable:$true] %s98_s26  ;;  %s101_s28 = int_to_ptr.vmem [resolvable:$true] %s100_s28 }
  0x12   : > { %p805_p13 = pnand %p580_p10, %p779_p5  ;;  %p555_p0 = scmp.ge.s32.totalorder %s719_s9, 1 }
  0x13   : > { %p108_p1 = scmp.lt.s32.totalorder %s719_s9, 3  ;;  %s88_s30 = scalar_lea.sflag [#allocation5], %s87_s20 }
  0x14   : > { %s623_s2 = sshra.s32 %s99_s26, 4  ;;  %p627_p3 = pneg %p805_p13  ;;  %s624_s2 = int_to_ptr.hbm [resolvable:$true] %s623_s2 }
  0x15   : > { %s625_s3 = scalar_lea.hbm %s624_s2, 64  ;;  %s630_s11 = scalar_lea.hbm %s922_s0, 128 }
  0x16   : > { %p626_p2 = scmp.ne.s32.totalorder %s624_s2, %s625_s3  ;;  %p631_p5 = scmp.lt.s32.totalorder %s624_s2, %s922_s0 }
  0x17   : > { %p632_p8 = scmp.lt.s32.totalorder %s630_s11, %s625_s3 }
  0x18   : > { %p628_p4 = pnand %p627_p3, %p626_p2 }
  0x19   : > { %p633_p10 = por %p632_p8, %p631_p5 }
  0x1a   : > { %p629_p7 = pneg %p628_p4 }
  0x1c   : > { %p634_p9 = pnand %p633_p10, %p629_p7 }
  0x1e   : > { %637 = shalt.err (!%p634_p9)
}
  0x1f   : > { %s721_s16 = smov 128   ;;  %s722_s20 = smov 8  }
  0x20   : > { %575 = dma.hbm_to_vmem [thread:$0]  (!%p805_p13), %s99_s26, 1024, %s101_s28, %s88_s30, %s721_s16, %s721_s16, %s722_s20  }
  0x21   : > { %p109_p2 = pnand %p555_p0, %p108_p1 }
  0x22   : > { %s826_s21 = sand.u32 (!%p109_p2), 1, %s711_s7  }
  0x23   : > { %112 = sbr.rel (%p109_p2) target bundleno = 374 (0x176), region = 24  ;;  %s556_s22 = sshll.u32 (!%p109_p2), %s826_s21, 6 }
  0x24   : > { %s115_s23 = scalar_lea.sflag (!%p109_p2), [#allocation5], %s826_s21  ;;  %s118_s24 = scalar_lea.vmem (!%p109_p2), [#allocation4], %s556_s22 }
  0x28   : > { %698 = dma.done.wait (%p783_p6), %s115_s23, 1024  }
  0x29   : > { %700 = vsyncadd (%p783_p6), %s115_s23, 4294966272  ;;  %vm207_vm0 = vcmask 148480   ;;  %v723_v0 = vmov 0.0   ;;  %v142_v1 = vld [vmem:[%s118_s24 + $0x10] sm:$0xff]  ;;  %v140_v2 = vld [vmem:[%s118_s24] sm:$0xff]  ;;  %s724_s25 = smov 2  }
  0x2a   : > { %210 = vst.msk [vmem:[#allocation2 + $0x30] sm:$0x3] %vm207_vm0, %v723_v0  ;;  %160 = vrot.lane.b32.xlu1 %v142_v1, %s724_s25  ;;  %156 = vrot.lane.b32.xlu0 %v140_v2, %s724_s25  ;;  %v144_v3 = vld [vmem:[%s118_s24 + $0x20] sm:$0xff]  ;;  %v143_v4 = vld [vmem:[%s118_s24 + $0x18] sm:$0xff]  ;;  %vm180_vm1 = vcmask 15360   ;;  %vm189_vm2 = vcmask 146432  }
  0x2b   : > { %208 = vst.msk [vmem:[#allocation2] sm:$0x3] %vm207_vm0, %v723_v0  ;;  %164 = vrot.lane.b32.xlu2 %v144_v3, %s724_s25  ;;  %v141_v5 = vld [vmem:[%s118_s24 + $0x8] sm:$0xff]  ;;  %v147_v7 = vld [vmem:[%s118_s24 + $0x38] sm:$0xff]  ;;  %v146_v8 = vld [vmem:[%s118_s24 + $0x30] sm:$0xff]  ;;  %vm212_vm3 = vcmask 147456  }
  0x2c   : > { %209 = vst.msk [vmem:[#allocation2 + $0x18] sm:$0x3] %vm207_vm0, %v723_v0  ;;  %v145_v6 = vld [vmem:[%s118_s24 + $0x28] sm:$0xff]  ;;  %vm198_vm4 = vcmask 154624   ;;  %s725_s17 = smov 127   ;;  %s726_s26 = smov 126  }
  0x2d   : > { %211 = vst.msk [vmem:[#allocation2 + $0x48] sm:$0x3] %vm207_vm0, %v723_v0  ;;  %s727_s27 = smov 125   ;;  %vm449_vm5 = vcmask 130048   ;;  %s870_s28 = scalar_lea.vmem [#allocation7], %s556_s22 }
  0x2e   : > { %215 = vst.msk [vmem:[#allocation2 + $0x42] sm:$0x1] %vm212_vm3, %v723_v0  ;;  %s567_s29 = sshll.u32 %s761_s10, 6  ;;  %s472_s4 = sshll.u32 %s870_s28, 4  ;;  %s473_s4 = int_to_ptr.vmem [resolvable:$true] %s472_s4 }
  0x2f   : > { %213 = vst.msk [vmem:[#allocation2 + $0x12] sm:$0x1] %vm212_vm3, %v723_v0  ;;  %s471_s3 = scalar_lea.hbm %s923_s1, %s567_s29  ;;  %s459_s10 = scalar_lea.sflag [#allocation6], %s826_s21 }
  0x30   : > { %214 = vst.msk [vmem:[#allocation2 + $0x2a] sm:$0x1] %vm212_vm3, %v723_v0  ;;  %s474_s5 = sshll.u32 %s471_s3, 4  ;;  %s673_s20 = scalar_lea.hbm %s923_s1, 128  ;;  %s475_s5 = int_to_ptr.hbm [resolvable:$true] %s474_s5 }
  0x31   : > { %216 = vst.msk [vmem:[#allocation2 + $0x5a] sm:$0x1] %vm212_vm3, %v723_v0  ;;  %s667_s11 = sshra.s32 %s475_s5, 4  ;;  %s668_s11 = int_to_ptr.hbm [resolvable:$true] %s667_s11 }
  0x32   : > { %162 = vrot.lane.b32.xlu1 %v143_v4, %s724_s25  ;;  %158 = vrot.lane.b32.xlu0 %v141_v5, %s724_s25  ;;  %s669_s13 = scalar_lea.hbm %s668_s11, 64  ;;  %p674_p0 = scmp.lt.s32.totalorder %s668_s11, %s923_s1 }
  0x33   : > { %166 = vrot.lane.b32.xlu2 %v145_v6, %s724_s25  ;;  %p670_p6 = scmp.ne.s32.totalorder %s668_s11, %s669_s13  ;;  %p675_p1 = scmp.lt.s32.totalorder %s673_s20, %s669_s13 }
  0x35   : > { %p671_p9 = pnand %p670_p6, %p790_p11  ;;  %p676_p3 = por %p675_p1, %p674_p0 }
  0x37   : > { %p672_p13 = pneg %p671_p9 }
  0x39   : > { %p677_p4 = pnand %p676_p3, %p672_p13 }
  0x3a   : > { %170 = vrot.lane.b32.xlu1 %v147_v7, %s724_s25  ;;  %168 = vrot.lane.b32.xlu0 %v146_v8, %s724_s25 }
  0x85   : > { %v165_v9 = vpop.permute.xlu2 %164 }
  0x86   : > { %v185_v10 = vsel %vm180_vm1, 0.0, %v165_v9 }
  0x87   : > { %v194_v11 = vsel %vm189_vm2, %v185_v10, 0.0 }
  0x88   : > { %203 = vst.msk [vmem:[#allocation2 + $0x32] sm:$0xff] %vm198_vm4, %v194_v11 }
  0x8d   : > { %v167_v12 = vpop.permute.xlu2 %166 }
  0x8e   : > { %v186_v13 = vsel %vm180_vm1, 0.0, %v167_v12 }
  0x8f   : > { %v221_v14 = vld [vmem:[#allocation2 + $0x30] sm:$0xff]  ;;  %v195_v16 = vsel %vm189_vm2, %v186_v13, 0.0 }
  0x90   : > { %v237_v15 = vld [vmem:[#allocation2 + $0x31] sm:$0xff]  ;;  %v229_v17 = vmul.f32 0.125, %v221_v14  ;;  %204 = vst.msk [vmem:[#allocation2 + $0x3a] sm:$0xff] %vm198_vm4, %v195_v16 }
  0x91   : > { %v245_v18 = vmul.f32 0.375, %v237_v15  ;;  %v261_v19 = vld [vmem:[#allocation2 + $0x32] sm:$0xff] }
  0x92   : > { %v269_v21 = vmul.f32 0.375, %v261_v19 }
  0x93   : > { %v253_v20 = vadd.f32 %v245_v18, %v229_v17 }
  0x95   : > { %v277_v22 = vadd.f32 %v269_v21, %v253_v20 }
  0x97   : > { %v222_v23 = vld [vmem:[#allocation2 + $0x38] sm:$0xff] }
  0x98   : > { %v238_v24 = vld [vmem:[#allocation2 + $0x39] sm:$0xff]  ;;  %v230_v26 = vmul.f32 0.125, %v222_v23 }
  0x99   : > { %v262_v25 = vld [vmem:[#allocation2 + $0x3a] sm:$0xff]  ;;  %v246_v27 = vmul.f32 0.375, %v238_v24 }
  0x9a   : > { %v270_v28 = vmul.f32 0.375, %v262_v25  ;;  %v285_v29 = vld [vmem:[#allocation2 + $0x33] sm:$0xff]  ;;  %v286_v30 = vld [vmem:[#allocation2 + $0x3b] sm:$0xff] }
  0x9b   : > { %v293_v31 = vmul.f32 0.125, %v285_v29  ;;  %v254_v32 = vadd.f32 %v246_v27, %v230_v26  ;;  %v294_v33 = vmul.f32 0.125, %v286_v30 }
  0x9c   : > { %v161_v34 = vpop.permute.xlu1 %160  ;;  %v157_v35 = vpop.permute.xlu0 %156 }
  0x9d   : > { %v301_v36 = vadd.f32 %v293_v31, %v277_v22  ;;  %v183_v37 = vsel %vm180_vm1, 0.0, %v161_v34  ;;  %v181_v38 = vsel %vm180_vm1, 0.0, %v157_v35  ;;  %v278_v39 = vadd.f32 %v270_v28, %v254_v32 }
  0x9e   : > { %v192_v40 = vsel %vm189_vm2, %v183_v37, 0.0  ;;  %v190_v41 = vsel %vm189_vm2, %v181_v38, 0.0 }
  0x9f   : > { %309 = vst.msk [vmem:[#allocation3 + $0x20] sm:$0xff] %vm198_vm4, %v301_v36  ;;  %v302_v42 = vadd.f32 %v294_v33, %v278_v39 }
  0xa0   : > { %201 = vst.msk [vmem:[#allocation2 + $0x1a] sm:$0xff] %vm198_vm4, %v192_v40 }
  0xa1   : > { %199 = vst.msk [vmem:[#allocation2 + $0x2] sm:$0xff] %vm198_vm4, %v190_v41 }
  0xa2   : > { %310 = vst.msk [vmem:[#allocation3 + $0x28] sm:$0xff] %vm198_vm4, %v302_v42 }
  0xa4   : > { %v163_v43 = vpop.permute.xlu1 %162  ;;  %v159_v44 = vpop.permute.xlu0 %158 }
  0xa5   : > { %v184_v45 = vsel %vm180_vm1, 0.0, %v163_v43  ;;  %v182_v46 = vsel %vm180_vm1, 0.0, %v159_v44 }
  0xa6   : > { %v193_v49 = vsel %vm189_vm2, %v184_v45, 0.0  ;;  %v191_v50 = vsel %vm189_vm2, %v182_v46, 0.0 }
  0xa7   : > { %v219_v47 = vld [vmem:[#allocation2 + $0x18] sm:$0xff]  ;;  %202 = vst.msk [vmem:[#allocation2 + $0x22] sm:$0xff] %vm198_vm4, %v193_v49 }
  0xa8   : > { %v235_v48 = vld [vmem:[#allocation2 + $0x19] sm:$0xff]  ;;  %v233_v52 = vld [vmem:[#allocation2 + $0x1] sm:$0xff]  ;;  %v227_v53 = vmul.f32 0.125, %v219_v47  ;;  %200 = vst.msk [vmem:[#allocation2 + $0xa] sm:$0xff] %vm198_vm4, %v191_v50 }
  0xa9   : > { %v217_v51 = vld [vmem:[#allocation2] sm:$0xff]  ;;  %v243_v54 = vmul.f32 0.375, %v235_v48  ;;  %v241_v57 = vmul.f32 0.375, %v233_v52 }
  0xaa   : > { %v259_v55 = vld [vmem:[#allocation2 + $0x1a] sm:$0xff]  ;;  %v225_v56 = vmul.f32 0.125, %v217_v51  ;;  %v257_v59 = vld [vmem:[#allocation2 + $0x2] sm:$0xff] }
  0xab   : > { %v267_v58 = vmul.f32 0.375, %v259_v55  ;;  %v251_v62 = vadd.f32 %v243_v54, %v227_v53  ;;  %v265_v3 = vmul.f32 0.375, %v257_v59 }
  0xac   : > { %v171_v60 = vpop.permute.xlu1 %170  ;;  %v169_v61 = vpop.permute.xlu0 %168  ;;  %v249_v63 = vadd.f32 %v241_v57, %v225_v56 }
  0xad   : > { %v188_v0 = vsel %vm180_vm1, 0.0, %v171_v60  ;;  %v187_v1 = vsel %vm180_vm1, 0.0, %v169_v61  ;;  %v275_v14 = vadd.f32 %v267_v58, %v251_v62 }
  0xae   : > { %v197_v2 = vsel %vm189_vm2, %v188_v0, 0.0  ;;  %v220_v4 = vld [vmem:[#allocation2 + $0x20] sm:$0xff]  ;;  %v196_v7 = vsel %vm189_vm2, %v187_v1, 0.0  ;;  %v273_v15 = vadd.f32 %v265_v3, %v249_v63  ;;  %v318_v63 = vld [vmem:[#allocation3 + $0x28] sm:$0xff] }
  0xaf   : > { %v236_v5 = vld [vmem:[#allocation2 + $0x21] sm:$0xff]  ;;  %206 = vst.msk [vmem:[#allocation2 + $0x52] sm:$0xff] %vm198_vm4, %v197_v2  ;;  %v228_v8 = vmul.f32 0.125, %v220_v4  ;;  %v234_v18 = vld [vmem:[#allocation2 + $0x9] sm:$0xff]  ;;  %v334_v1 = vmul.f32 0.375, %v318_v63 }
  0xb0   : > { %v260_v6 = vld [vmem:[#allocation2 + $0x22] sm:$0xff]  ;;  %v244_v9 = vmul.f32 0.375, %v236_v5  ;;  %v258_v19 = vld [vmem:[#allocation2 + $0xa] sm:$0xff]  ;;  %v242_v23 = vmul.f32 0.375, %v234_v18  ;;  %205 = vst.msk [vmem:[#allocation2 + $0x4a] sm:$0xff] %vm198_vm4, %v196_v7 }
  0xb1   : > { %v268_v10 = vmul.f32 0.375, %v260_v6  ;;  %v283_v11 = vld [vmem:[#allocation2 + $0x1b] sm:$0xff]  ;;  %v284_v12 = vld [vmem:[#allocation2 + $0x23] sm:$0xff]  ;;  %v282_v26 = vld [vmem:[#allocation2 + $0xb] sm:$0xff]  ;;  %v266_v29 = vmul.f32 0.375, %v258_v19 }
  0xb2   : > { %v218_v13 = vld [vmem:[#allocation2 + $0x8] sm:$0xff]  ;;  %v291_v16 = vmul.f32 0.125, %v283_v11  ;;  %v252_v21 = vadd.f32 %v244_v9, %v228_v8  ;;  %v292_v22 = vmul.f32 0.125, %v284_v12  ;;  %v290_v33 = vmul.f32 0.125, %v282_v26  ;;  %v317_v3 = vld [vmem:[#allocation3 + $0x20] sm:$0xff] }
  0xb3   : > { %v226_v17 = vmul.f32 0.125, %v218_v13  ;;  %v281_v20 = vld [vmem:[#allocation2 + $0x3] sm:$0xff]  ;;  %v333_v5 = vmul.f32 0.375, %v317_v3  ;;  %v325_v11 = vmul.f32 0.125, %v317_v3 }
  0xb4   : > { %v289_v24 = vmul.f32 0.125, %v281_v20  ;;  %v299_v25 = vadd.f32 %v291_v16, %v275_v14  ;;  %v276_v27 = vadd.f32 %v268_v10, %v252_v21 }
  0xb5   : > { %v250_v28 = vadd.f32 %v242_v23, %v226_v17 }
  0xb6   : > { %v297_v30 = vadd.f32 %v289_v24, %v273_v15  ;;  %307 = vst.msk [vmem:[#allocation3 + $0x10] sm:$0xff] %vm198_vm4, %v299_v25  ;;  %v300_v31 = vadd.f32 %v292_v22, %v276_v27  ;;  %v264_v35 = vld [vmem:[#allocation2 + $0x52] sm:$0xff]  ;;  %v326_v15 = vmul.f32 0.125, %v318_v63 }
  0xb7   : > { %v274_v32 = vadd.f32 %v266_v29, %v250_v28  ;;  %v288_v36 = vld [vmem:[#allocation2 + $0x53] sm:$0xff]  ;;  %v223_v37 = vld [vmem:[#allocation2 + $0x48] sm:$0xff]  ;;  %v272_v45 = vmul.f32 0.375, %v264_v35 }
  0xb8   : > { %305 = vst.msk [vmem:[#allocation3] sm:$0xff] %vm198_vm4, %v297_v30  ;;  %v224_v38 = vld [vmem:[#allocation2 + $0x50] sm:$0xff]  ;;  %v231_v40 = vmul.f32 0.125, %v223_v37  ;;  %v296_v52 = vmul.f32 0.125, %v288_v36 }
  0xb9   : > { %308 = vst.msk [vmem:[#allocation3 + $0x18] sm:$0xff] %vm198_vm4, %v300_v31  ;;  %v298_v34 = vadd.f32 %v290_v33, %v274_v32  ;;  %v239_v39 = vld [vmem:[#allocation2 + $0x49] sm:$0xff]  ;;  %v232_v41 = vmul.f32 0.125, %v224_v38  ;;  %v240_v42 = vld [vmem:[#allocation2 + $0x51] sm:$0xff] }
  0xba   : > { %v247_v43 = vmul.f32 0.375, %v239_v39  ;;  %v263_v44 = vld [vmem:[#allocation2 + $0x4a] sm:$0xff]  ;;  %v248_v46 = vmul.f32 0.375, %v240_v42 }
  0xbb   : > { %306 = vst.msk [vmem:[#allocation3 + $0x8] sm:$0xff] %vm198_vm4, %v298_v34  ;;  %v271_v47 = vmul.f32 0.375, %v263_v44  ;;  %v287_v48 = vld [vmem:[#allocation2 + $0x4b] sm:$0xff] }
  0xbc   : > { %v255_v49 = vadd.f32 %v247_v43, %v231_v40  ;;  %v295_v50 = vmul.f32 0.125, %v287_v48  ;;  %v256_v53 = vadd.f32 %v248_v46, %v232_v41 }
  0xbd   : > { %v315_v51 = vld [vmem:[#allocation3 + $0x10] sm:$0xff] }
  0xbe   : > { %v331_v54 = vmul.f32 0.375, %v315_v51  ;;  %v279_v56 = vadd.f32 %v271_v47, %v255_v49  ;;  %v280_v58 = vadd.f32 %v272_v45, %v256_v53  ;;  %v323_v12 = vmul.f32 0.125, %v315_v51 }
  0xbf   : > { %v313_v55 = vld [vmem:[#allocation3] sm:$0xff] }
  0xc0   : > { %v329_v57 = vmul.f32 0.375, %v313_v55  ;;  %349 = vrot.lane.b32.xlu1 %v331_v54, %s725_s17  ;;  %v303_v59 = vadd.f32 %v295_v50, %v279_v56  ;;  %v304_v61 = vadd.f32 %v296_v52, %v280_v58  ;;  %v316_v0 = vld [vmem:[#allocation3 + $0x18] sm:$0xff]  ;;  %v321_v10 = vmul.f32 0.125, %v313_v55 }
  0xc1   : > { %v332_v2 = vmul.f32 0.375, %v316_v0  ;;  %v324_v13 = vmul.f32 0.125, %v316_v0 }
  0xc2   : > { %345 = vrot.lane.b32.xlu2 %v329_v57, %s725_s17  ;;  %v314_v60 = vld [vmem:[#allocation3 + $0x8] sm:$0xff]  ;;  %311 = vst.msk [vmem:[#allocation3 + $0x30] sm:$0xff] %vm198_vm4, %v303_v59 }
  0xc3   : > { %v330_v62 = vmul.f32 0.375, %v314_v60  ;;  %312 = vst.msk [vmem:[#allocation3 + $0x38] sm:$0xff] %vm198_vm4, %v304_v61  ;;  %v322_v9 = vmul.f32 0.125, %v314_v60 }
  0xc5   : > { %347 = vrot.lane.b32.xlu0 %v330_v62, %s725_s17 }
  0xc8   : > { %355 = vrot.lane.b32.xlu1 %v334_v1, %s725_s17 }
  0xc9   : > { %v319_v4 = vld [vmem:[#allocation3 + $0x30] sm:$0xff] }
  0xca   : > { %351 = vrot.lane.b32.xlu2 %v332_v2, %s725_s17  ;;  %v335_v6 = vmul.f32 0.375, %v319_v4  ;;  %v320_v7 = vld [vmem:[#allocation3 + $0x38] sm:$0xff]  ;;  %v327_v16 = vmul.f32 0.125, %v319_v4 }
  0xcb   : > { %v336_v8 = vmul.f32 0.375, %v320_v7  ;;  %v328_v14 = vmul.f32 0.125, %v320_v7 }
  0xcd   : > { %353 = vrot.lane.b32.xlu0 %v333_v5, %s725_s17 }
  0xd0   : > { %377 = vrot.lane.b32.xlu1 %v329_v57, %s726_s26 }
  0xd2   : > { %357 = vrot.lane.b32.xlu2 %v335_v6, %s725_s17 }
  0xd5   : > { %359 = vrot.lane.b32.xlu0 %v336_v8, %s725_s17 }
  0xd8   : > { %383 = vrot.lane.b32.xlu1 %v332_v2, %s726_s26 }
  0xda   : > { %379 = vrot.lane.b32.xlu2 %v330_v62, %s726_s26 }
  0xdd   : > { %381 = vrot.lane.b32.xlu0 %v331_v54, %s726_s26 }
  0xe0   : > { %389 = vrot.lane.b32.xlu1 %v335_v6, %s726_s26 }
  0xe2   : > { %385 = vrot.lane.b32.xlu2 %v333_v5, %s726_s26 }
  0xe5   : > { %387 = vrot.lane.b32.xlu0 %v334_v1, %s726_s26 }
  0xe8   : > { %419 = vrot.lane.b32.xlu1 %v322_v9, %s727_s27 }
  0xea   : > { %391 = vrot.lane.b32.xlu2 %v336_v8, %s726_s26 }
  0xed   : > { %417 = vrot.lane.b32.xlu0 %v321_v10, %s727_s27 }
  0xf0   : > { %425 = vrot.lane.b32.xlu1 %v325_v11, %s727_s27 }
  0xf2   : > { %421 = vrot.lane.b32.xlu2 %v323_v12, %s727_s27 }
  0xf5   : > { %423 = vrot.lane.b32.xlu0 %v324_v13, %s727_s27 }
  0xf8   : > { %431 = vrot.lane.b32.xlu1 %v328_v14, %s727_s27 }
  0xfa   : > { %427 = vrot.lane.b32.xlu2 %v326_v15, %s727_s27 }
  0xfd   : > { %429 = vrot.lane.b32.xlu0 %v327_v16, %s727_s27 }
 0x11c   : > { %v346_v17 = vpop.permute.xlu2 %345 }
 0x11d   : > { %v369_v45 = vadd.f32 %v346_v17, %v321_v10 }
 0x124   : > { %v352_v18 = vpop.permute.xlu2 %351 }
 0x125   : > { %v372_v53 = vadd.f32 %v352_v18, %v324_v13 }
 0x12c   : > { %v358_v19 = vpop.permute.xlu2 %357 }
 0x12d   : > { %v375_v61 = vadd.f32 %v358_v19, %v327_v16 }
 0x132   : > { %v350_v20 = vpop.permute.xlu1 %349 }
 0x133   : > { %v371_v30 = vadd.f32 %v350_v20, %v323_v12 }
 0x134   : > { %v380_v21 = vpop.permute.xlu2 %379 }
 0x137   : > { %v348_v22 = vpop.permute.xlu0 %347 }
 0x138   : > { %v370_v36 = vadd.f32 %v348_v22, %v322_v9 }
 0x13a   : > { %v356_v23 = vpop.permute.xlu1 %355  ;;  %v402_v41 = vadd.f32 %v380_v21, %v370_v36 }
 0x13b   : > { %v374_v37 = vadd.f32 %v356_v23, %v326_v15 }
 0x13c   : > { %v386_v24 = vpop.permute.xlu2 %385 }
 0x13f   : > { %v354_v25 = vpop.permute.xlu0 %353 }
 0x140   : > { %v373_v46 = vadd.f32 %v354_v25, %v325_v11 }
 0x142   : > { %v378_v26 = vpop.permute.xlu1 %377  ;;  %v405_v50 = vadd.f32 %v386_v24, %v373_v46 }
 0x143   : > { %v401_v47 = vadd.f32 %v378_v26, %v369_v45 }
 0x144   : > { %v392_v27 = vpop.permute.xlu2 %391 }
 0x147   : > { %v360_v28 = vpop.permute.xlu0 %359 }
 0x148   : > { %v376_v54 = vadd.f32 %v360_v28, %v328_v14 }
 0x14a   : > { %v384_v29 = vpop.permute.xlu1 %383  ;;  %v408_v58 = vadd.f32 %v392_v27, %v376_v54 }
 0x14b   : > { %v404_v55 = vadd.f32 %v384_v29, %v372_v53 }
 0x14c   : > { %v422_v31 = vpop.permute.xlu2 %421 }
 0x14f   : > { %v382_v32 = vpop.permute.xlu0 %381 }
 0x150   : > { %v403_v33 = vadd.f32 %v382_v32, %v371_v30 }
 0x152   : > { %v443_v34 = vadd.f32 %v422_v31, %v403_v33  ;;  %v390_v35 = vpop.permute.xlu1 %389 }
 0x153   : > { %v407_v62 = vadd.f32 %v390_v35, %v375_v61 }
 0x154   : > { %452 = vst.msk [vmem:[%s870_s28 + $0x10] sm:$0xff] %vm449_vm5, %v443_v34  ;;  %v428_v40 = vpop.permute.xlu2 %427 }
 0x157   : > { %v388_v38 = vpop.permute.xlu0 %387 }
 0x158   : > { %v406_v39 = vadd.f32 %v388_v38, %v374_v37 }
 0x15a   : > { %v446_v42 = vadd.f32 %v428_v40, %v406_v39  ;;  %v420_v43 = vpop.permute.xlu1 %419 }
 0x15b   : > { %v442_v44 = vadd.f32 %v420_v43, %v402_v41 }
 0x15c   : > { %455 = vst.msk [vmem:[%s870_s28 + $0x28] sm:$0xff] %vm449_vm5, %v446_v42 }
 0x15d   : > { %451 = vst.msk [vmem:[%s870_s28 + $0x8] sm:$0xff] %vm449_vm5, %v442_v44 }
 0x15f   : > { %v418_v48 = vpop.permute.xlu0 %417 }
 0x160   : > { %v441_v49 = vadd.f32 %v418_v48, %v401_v47 }
 0x162   : > { %450 = vst.msk [vmem:[%s870_s28] sm:$0xff] %vm449_vm5, %v441_v49  ;;  %v426_v51 = vpop.permute.xlu1 %425 }
 0x163   : > { %v445_v52 = vadd.f32 %v426_v51, %v405_v50 }
 0x165   : > { %454 = vst.msk [vmem:[%s870_s28 + $0x20] sm:$0xff] %vm449_vm5, %v445_v52 }
 0x167   : > { %v424_v56 = vpop.permute.xlu0 %423 }
 0x168   : > { %v444_v57 = vadd.f32 %v424_v56, %v404_v55 }
 0x16a   : > { %453 = vst.msk [vmem:[%s870_s28 + $0x18] sm:$0xff] %vm449_vm5, %v444_v57  ;;  %v432_v59 = vpop.permute.xlu1 %431 }
 0x16b   : > { %v448_v60 = vadd.f32 %v432_v59, %v408_v58 }
 0x16d   : > { %457 = vst.msk [vmem:[%s870_s28 + $0x38] sm:$0xff] %vm449_vm5, %v448_v60 }
 0x16f   : > { %v430_v63 = vpop.permute.xlu0 %429 }
 0x170   : > { %v447_v0 = vadd.f32 %v430_v63, %v407_v62 }
 0x172   : > { %456 = vst.msk [vmem:[%s870_s28 + $0x30] sm:$0xff] %vm449_vm5, %v447_v0 }
 0x173   : > { %680 = shalt.err (!%p677_p4)
}
 0x174   : > { %s728_s21 = smov 128   ;;  %s729_s24 = smov 8  }
 0x175   : > { %570 = dma.vmem_to_hbm [thread:$0]  (%p790_p11), %s473_s4, 1024, %s475_s5, %s459_s10, %s728_s21, %s728_s21, %s729_s24  }
 0x176 PF: > { %s489_s25 = sand.u32 1, %s707_s6   ;;  %p929_p7 = scmp.ge.s32.totalorder %s719_s9, 2 }
 0x177   : > { %s490_s17 = scalar_lea.sflag [#allocation6], %s489_s25 }
 0x178   : > { %p577_p5 = pnand %p929_p7, %p794_p12 }
 0x17a   : > { %p578_p8 = pneg %p577_p5 }
 0x17c   : > { %702 = dma.done.wait (%p578_p8), %s490_s17, 1024  }
 0x17d   : > { %704 = vsyncadd (%p578_p8), %s490_s17, 4294966272  ;;  %p14_p10 = scmp.ge.s32.totalorder %s765_s12, 4   ;;  %s930_s6 = smov %s711_s7 }
 0x17e   : > { %s931_s7 = smov %s715_s8  ;;  %s932_s8 = smov %s777_s15 }
 0x17f   : > { %s933_s9 = smov %s765_s12  ;;  %16 = sbr.rel (!%p14_p10) target bundleno = 5 (0x5), region = 69 }
 0x184   :  { %496 = vsyncpa [#allocation5], 1 }
 0x185   :  { %498 = vsyncpa [#allocation5 + $0x1], 1 }
 0x186   :  { %499 = vsyncpa [#allocation6], 1 }
 0x187   :  { %501 = vsyncpa [#allocation6 + $0x1], 1 }

</bundles_post_ra>
